<compile_context>
chip_gen: v7x
topology: tpu7x:2x2x1
jax: 0.10.0
libtpu: 0.0.40
codegen_flags: <defaults>
</compile_context>

<pallas_src>
import functools

import jax
import jax.numpy as jnp
from jax.experimental import pallas as pl
from jax.experimental.pallas import tpu as pltpu

LN_EPS = 1e-5


def _round_up(a, b):
    return ((a + b - 1) // b) * b


# ----------------------------- Pallas kernel --------------------------------
def _ff_kernel(xt_ref, g_ref, b_ref, w1t_ref, b1_ref, w2t_ref, b2_ref, o_ref,
               *, bf16_dots):
    # Transposed layout: xt_ref is (D, tm) -- feature dim D on sublanes,
    # tokens on lanes.  LayerNorm reduces over sublanes (axis 0).
    x = xt_ref[...].astype(jnp.float32)                        # (D, tm)
    mean = jnp.mean(x, axis=0, keepdims=True)                  # (1, tm)
    var = jnp.mean(jnp.square(x - mean), axis=0, keepdims=True)
    y = (x - mean) * jax.lax.rsqrt(var + LN_EPS)
    y = y * g_ref[...] + b_ref[...]                            # (D,1) lane-broadcast

    if bf16_dots:
        # Weights are already bf16 (cast once in the wrapper); only the
        # per-step activation operand needs the cast.  Accumulation stays f32.
        y = y.astype(jnp.bfloat16)

    # h^T = w1^T @ y^T : (Dh, D) @ (D, tm) -> (Dh, tm)
    h = jnp.dot(w1t_ref[...], y, preferred_element_type=jnp.float32) + b1_ref[...]
    h = jax.nn.gelu(h, approximate=True)                       # f32, EUP tanh path

    if bf16_dots:
        h = h.astype(jnp.bfloat16)

    # o^T = w2^T @ h^T : (D, Dh) @ (Dh, tm) -> (D, tm)
    o = jnp.dot(w2t_ref[...], h, preferred_element_type=jnp.float32) + b2_ref[...]
    o_ref[...] = o.astype(o_ref.dtype)


# ----------------------------- wrapper ---------------------------------------
def feed_forward(x, params, *, tm_max=1024, bf16_dots=False):
    """Applies LN -> Linear -> GELU -> Linear over the last dim of x."""
    shape = x.shape
    D = shape[-1]
    Dh = params["w1"].shape[1]

    x2 = x.reshape(-1, D)
    M = x2.shape[0]

    # Pick the largest lane tile (multiple of 128, capped) that leaves >= 2 grid
    # steps so both v7x TensorCores get work; fall back to one 128-wide tile for
    # tiny / ragged M.
    M128 = _round_up(M, 128)
    n128 = M128 // 128
    tm = min(tm_max, (n128 // 2) * 128) if n128 >= 2 else 128
    tm = max(tm, 128)
    Mp = _round_up(M, tm)

    # Transpose so tokens land on the lane dim; pad the lane dim up to Mp.
    # Padded columns go through LN on zeros (var+eps > 0, no NaNs) and are
    # sliced off below.  Both are pure XLA layout plumbing in the wrapper.
    xt = x2.T                                                   # (D, M)
    if Mp != M:
        xt = jnp.pad(xt, ((0, 0), (0, Mp - M)))

    w1t = params["w1"].T                                        # (Dh, D)
    w2t = params["w2"].T                                        # (D, Dh)
    if bf16_dots:
        w1t = w1t.astype(jnp.bfloat16)                          # cast once, resident
        w2t = w2t.astype(jnp.bfloat16)

    grid = (Mp // tm,)
    kern = functools.partial(_ff_kernel, bf16_dots=bf16_dots)

    out_t = pl.pallas_call(
        kern,
        out_shape=jax.ShapeDtypeStruct((D, Mp), x.dtype),
        grid=grid,
        in_specs=[
            pl.BlockSpec((D, tm), lambda i: (0, i)),    # x^T: tiled over lanes
            pl.BlockSpec((D, 1), lambda i: (0, 0)),     # ln gamma (resident)
            pl.BlockSpec((D, 1), lambda i: (0, 0)),     # ln beta
            pl.BlockSpec((Dh, D), lambda i: (0, 0)),    # w1^T (resident)
            pl.BlockSpec((Dh, 1), lambda i: (0, 0)),    # b1
            pl.BlockSpec((D, Dh), lambda i: (0, 0)),    # w2^T (resident)
            pl.BlockSpec((D, 1), lambda i: (0, 0)),     # b2
        ],
        out_specs=pl.BlockSpec((D, tm), lambda i: (0, i)),
        compiler_params=pltpu.CompilerParams(
            dimension_semantics=("parallel",)),
    )(xt,
      params["ln_g"].reshape(D, 1), params["ln_b"].reshape(D, 1),
      w1t, params["b1"].reshape(Dh, 1),
      w2t, params["b2"].reshape(D, 1))

    out = out_t[:, :M] if Mp != M else out_t
    return out.T.reshape(shape)


# ----------------------------- reference & params -----------------------------
def feed_forward_ref(x, p):
    mean = jnp.mean(x, axis=-1, keepdims=True)
    var = jnp.mean(jnp.square(x - mean), axis=-1, keepdims=True)
    y = (x - mean) * jax.lax.rsqrt(var + LN_EPS) * p["ln_g"] + p["ln_b"]
    h = jax.nn.gelu(y @ p["w1"] + p["b1"], approximate=True)
    return h @ p["w2"] + p["b2"]


def init_ff_params(key, dim, hidden_dim):
    k1, k2 = jax.random.split(key)
    return {
        "ln_g": jnp.ones((dim,), jnp.float32),
        "ln_b": jnp.zeros((dim,), jnp.float32),
        "w1": (0.02 * jax.random.normal(k1, (dim, hidden_dim))).astype(jnp.float32),
        "b1": jnp.zeros((hidden_dim,), jnp.float32),
        "w2": (0.02 * jax.random.normal(k2, (hidden_dim, dim))).astype(jnp.float32),
        "b2": jnp.zeros((dim,), jnp.float32),
    }


# ----------------------------- main --------------------------------------------
if __name__ == "__main__":
    root = jax.random.PRNGKey(0)
    k_param, k_x1, k_x2 = jax.random.split(root, 3)

    DIM, MLP_DIM = 32, 64          # matches ats_vit config (dim=32, mlp_dim=64)
    params = init_ff_params(k_param, DIM, MLP_DIM)

    # Primary input: batch=2, tokens=256 -> M=512 rows -> two 256-lane tiles.
    x = jax.random.normal(k_x1, (2, 256, DIM), dtype=jnp.float32)
    # Ragged input (exercises the pad-to-tile / slice-back path), n=17 tokens.
    x_ragged = jax.random.normal(k_x2, (2, 17, DIM), dtype=jnp.float32)

    fwd_f32 = jax.jit(functools.partial(feed_forward, bf16_dots=False))
    fwd_bf16 = jax.jit(functools.partial(feed_forward, bf16_dots=True))

    # f32 path: tight check against the pure-JAX reference.
    out = fwd_f32(x, params)
    jax.block_until_ready(out)
    ref = feed_forward_ref(x, params)
    assert out.shape == x.shape
    assert jnp.allclose(out, ref, atol=2e-5, rtol=2e-5), "f32 mismatch"

    out_r = fwd_f32(x_ragged, params)
    jax.block_until_ready(out_r)
    ref_r = feed_forward_ref(x_ragged, params)
    assert out_r.shape == x_ragged.shape
    assert jnp.allclose(out_r, ref_r, atol=2e-5, rtol=2e-5), "ragged f32 mismatch"

    # bf16-at-the-MXU path (v6e/v7x perf option): looser tolerance.
    out_b = fwd_bf16(x, params)
    jax.block_until_ready(out_b)
    assert jnp.allclose(out_b, ref, atol=1e-2), "bf16 mismatch"

    print("KERNEL_OK")
</pallas_src>

<mosaic_0001>
module attributes {stable_mosaic.version = 11 : i64} {
  func.func @_ff_kernel(%arg0: i32, %arg1: memref<32x256xf32, #tpu.memory_space<vmem>>, %arg2: memref<32x1xf32, #tpu.memory_space<vmem>>, %arg3: memref<32x1xf32, #tpu.memory_space<vmem>>, %arg4: memref<64x32xf32, #tpu.memory_space<vmem>>, %arg5: memref<64x1xf32, #tpu.memory_space<vmem>>, %arg6: memref<32x64xf32, #tpu.memory_space<vmem>>, %arg7: memref<32x1xf32, #tpu.memory_space<vmem>>, %arg8: memref<32x256xf32, #tpu.memory_space<vmem>>) attributes {dimension_semantics = [#tpu.dimension_semantics<parallel>], iteration_bounds = array<i64: 2>, scalar_prefetch = 0 : i64, scratch_operands = 0 : i64, tpu.core_type = #tpu.core_type<tc>, window_params = [{transform_indices = @transform_0, window_bounds = array<i64: 32, 256>}, {pipeline_mode = #tpu.pipeline_mode<synchronous>, transform_indices = @transform_1, window_bounds = array<i64: 32, 1>}, {pipeline_mode = #tpu.pipeline_mode<synchronous>, transform_indices = @transform_2, window_bounds = array<i64: 32, 1>}, {pipeline_mode = #tpu.pipeline_mode<synchronous>, transform_indices = @transform_3, window_bounds = array<i64: 64, 32>}, {pipeline_mode = #tpu.pipeline_mode<synchronous>, transform_indices = @transform_4, window_bounds = array<i64: 64, 1>}, {pipeline_mode = #tpu.pipeline_mode<synchronous>, transform_indices = @transform_5, window_bounds = array<i64: 32, 64>}, {pipeline_mode = #tpu.pipeline_mode<synchronous>, transform_indices = @transform_6, window_bounds = array<i64: 32, 1>}, {transform_indices = @transform_7, window_bounds = array<i64: 32, 256>}]} {
    %c0 = arith.constant 0 : index
    %c0_0 = arith.constant 0 : index
    %0 = vector.load %arg1[%c0, %c0_0] : memref<32x256xf32, #tpu.memory_space<vmem>>, vector<32x256xf32>
    %cst = arith.constant dense<0.000000e+00> : vector<256xf32>
    %1 = vector.multi_reduction <add>, %0, %cst [0] : vector<32x256xf32> to vector<256xf32>
    %2 = vector.shape_cast %1 : vector<256xf32> to vector<1x256xf32>
    %cst_1 = arith.constant 3.200000e+01 : f32
    %3 = vector.broadcast %cst_1 : f32 to vector<1x256xf32>
    %4 = arith.divf %2, %3 : vector<1x256xf32>
    %5 = vector.broadcast %4 : vector<1x256xf32> to vector<32x256xf32>
    %6 = arith.subf %0, %5 : vector<32x256xf32>
    %7 = arith.mulf %6, %6 : vector<32x256xf32>
    %cst_2 = arith.constant dense<0.000000e+00> : vector<256xf32>
    %8 = vector.multi_reduction <add>, %7, %cst_2 [0] : vector<32x256xf32> to vector<256xf32>
    %9 = vector.shape_cast %8 : vector<256xf32> to vector<1x256xf32>
    %cst_3 = arith.constant 3.200000e+01 : f32
    %10 = vector.broadcast %cst_3 : f32 to vector<1x256xf32>
    %11 = arith.divf %9, %10 : vector<1x256xf32>
    %12 = vector.broadcast %4 : vector<1x256xf32> to vector<32x256xf32>
    %13 = arith.subf %0, %12 : vector<32x256xf32>
    %cst_4 = arith.constant 9.99999974E-6 : f32
    %14 = vector.broadcast %cst_4 : f32 to vector<1x256xf32>
    %15 = arith.addf %11, %14 : vector<1x256xf32>
    %16 = math.rsqrt %15 : vector<1x256xf32>
    %17 = vector.broadcast %16 : vector<1x256xf32> to vector<32x256xf32>
    %18 = arith.mulf %13, %17 : vector<32x256xf32>
    %c0_5 = arith.constant 0 : index
    %c0_6 = arith.constant 0 : index
    %19 = vector.load %arg2[%c0_5, %c0_6] : memref<32x1xf32, #tpu.memory_space<vmem>>, vector<32x1xf32>
    %20 = vector.broadcast %19 : vector<32x1xf32> to vector<32x256xf32>
    %21 = arith.mulf %18, %20 : vector<32x256xf32>
    %c0_7 = arith.constant 0 : index
    %c0_8 = arith.constant 0 : index
    %22 = vector.load %arg3[%c0_7, %c0_8] : memref<32x1xf32, #tpu.memory_space<vmem>>, vector<32x1xf32>
    %23 = vector.broadcast %22 : vector<32x1xf32> to vector<32x256xf32>
    %24 = arith.addf %21, %23 : vector<32x256xf32>
    %c0_9 = arith.constant 0 : index
    %c0_10 = arith.constant 0 : index
    %25 = vector.load %arg4[%c0_9, %c0_10] : memref<64x32xf32, #tpu.memory_space<vmem>>, vector<64x32xf32>
    %cst_11 = arith.constant dense<0.000000e+00> : vector<64x256xf32>
    %26 = tpu.matmul %25, %24, %cst_11 {dimension_numbers = #tpu.dot_dimension_numbers<[1], [0], [0], [1], [0, 0, 1, 1], [], []>} : vector<64x32xf32>, vector<32x256xf32>, vector<64x256xf32> -> vector<64x256xf32>
    %c0_12 = arith.constant 0 : index
    %c0_13 = arith.constant 0 : index
    %27 = vector.load %arg5[%c0_12, %c0_13] : memref<64x1xf32, #tpu.memory_space<vmem>>, vector<64x1xf32>
    %28 = vector.broadcast %27 : vector<64x1xf32> to vector<64x256xf32>
    %29 = arith.addf %26, %28 : vector<64x256xf32>
    %30 = arith.mulf %29, %29 : vector<64x256xf32>
    %31 = arith.mulf %29, %30 : vector<64x256xf32>
    %cst_14 = arith.constant 4.471500e-02 : f32
    %32 = vector.broadcast %cst_14 : f32 to vector<64x256xf32>
    %33 = arith.mulf %32, %31 : vector<64x256xf32>
    %34 = arith.addf %29, %33 : vector<64x256xf32>
    %cst_15 = arith.constant 0.797884583 : f32
    %35 = vector.broadcast %cst_15 : f32 to vector<64x256xf32>
    %36 = arith.mulf %35, %34 : vector<64x256xf32>
    %37 = math.tanh %36 : vector<64x256xf32>
    %cst_16 = arith.constant 1.000000e+00 : f32
    %38 = vector.broadcast %cst_16 : f32 to vector<64x256xf32>
    %39 = arith.addf %38, %37 : vector<64x256xf32>
    %cst_17 = arith.constant 5.000000e-01 : f32
    %40 = vector.broadcast %cst_17 : f32 to vector<64x256xf32>
    %41 = arith.mulf %40, %39 : vector<64x256xf32>
    %42 = arith.mulf %29, %41 : vector<64x256xf32>
    %c0_18 = arith.constant 0 : index
    %c0_19 = arith.constant 0 : index
    %43 = vector.load %arg6[%c0_18, %c0_19] : memref<32x64xf32, #tpu.memory_space<vmem>>, vector<32x64xf32>
    %cst_20 = arith.constant dense<0.000000e+00> : vector<32x256xf32>
    %44 = tpu.matmul %43, %42, %cst_20 {dimension_numbers = #tpu.dot_dimension_numbers<[1], [0], [0], [1], [0, 0, 1, 1], [], []>} : vector<32x64xf32>, vector<64x256xf32>, vector<32x256xf32> -> vector<32x256xf32>
    %c0_21 = arith.constant 0 : index
    %c0_22 = arith.constant 0 : index
    %45 = vector.load %arg7[%c0_21, %c0_22] : memref<32x1xf32, #tpu.memory_space<vmem>>, vector<32x1xf32>
    %46 = vector.broadcast %45 : vector<32x1xf32> to vector<32x256xf32>
    %47 = arith.addf %44, %46 : vector<32x256xf32>
    %c0_23 = arith.constant 0 : index
    %c0_24 = arith.constant 0 : index
    %48 = vector.load %arg8[%c0_23, %c0_24] : memref<32x256xf32, #tpu.memory_space<vmem>>, vector<32x256xf32>
    tpu.vector_store %arg8[%c0_23, %c0_24], %47 {strides = array<i32>} : memref<32x256xf32, #tpu.memory_space<vmem>>, vector<32x256xf32>,
    return
  }
  func.func @transform_0(%arg0: i32) -> (i32, i32) {
    %c0_i32 = arith.constant 0 : i32
    %c0_i32_0 = arith.constant 0 : i32
    return %c0_i32, %arg0 : i32, i32
  }
  func.func @transform_1(%arg0: i32) -> (i32, i32) {
    %c0_i32 = arith.constant 0 : i32
    %c0_i32_0 = arith.constant 0 : i32
    %c0_i32_1 = arith.constant 0 : i32
    return %c0_i32, %c0_i32_0 : i32, i32
  }
  func.func @transform_2(%arg0: i32) -> (i32, i32) {
    %c0_i32 = arith.constant 0 : i32
    %c0_i32_0 = arith.constant 0 : i32
    %c0_i32_1 = arith.constant 0 : i32
    return %c0_i32, %c0_i32_0 : i32, i32
  }
  func.func @transform_3(%arg0: i32) -> (i32, i32) {
    %c0_i32 = arith.constant 0 : i32
    %c0_i32_0 = arith.constant 0 : i32
    %c0_i32_1 = arith.constant 0 : i32
    return %c0_i32, %c0_i32_0 : i32, i32
  }
  func.func @transform_4(%arg0: i32) -> (i32, i32) {
    %c0_i32 = arith.constant 0 : i32
    %c0_i32_0 = arith.constant 0 : i32
    %c0_i32_1 = arith.constant 0 : i32
    return %c0_i32, %c0_i32_0 : i32, i32
  }
  func.func @transform_5(%arg0: i32) -> (i32, i32) {
    %c0_i32 = arith.constant 0 : i32
    %c0_i32_0 = arith.constant 0 : i32
    %c0_i32_1 = arith.constant 0 : i32
    return %c0_i32, %c0_i32_0 : i32, i32
  }
  func.func @transform_6(%arg0: i32) -> (i32, i32) {
    %c0_i32 = arith.constant 0 : i32
    %c0_i32_0 = arith.constant 0 : i32
    %c0_i32_1 = arith.constant 0 : i32
    return %c0_i32, %c0_i32_0 : i32, i32
  }
  func.func @transform_7(%arg0: i32) -> (i32, i32) {
    %c0_i32 = arith.constant 0 : i32
    %c0_i32_0 = arith.constant 0 : i32
    return %c0_i32, %arg0 : i32, i32
  }
}

</mosaic_0001>

<bundles_post_ra>
// kernel: feed_forward.1
= control target key start
LH: loop header
LB: loop body
LE: loop exit
PB: predicated region body
PF: predicated region fallthrough
CT: control target
= control target key end

     0   :  { %s1206_s24 = smov 0   ;;  %s1208_s25 = smov 0   ;;  %s1516_s0 = inlined_call_operand.vmem [shape: f32[32,512], index: 0, kind: input, shape index: {}]   ;;  %s1517_s1 = inlined_call_operand.vmem [shape: f32[32,1], index: 1, kind: input, shape index: {}]   ;;  %s1518_s2 = inlined_call_operand.vmem [shape: f32[32,1], index: 2, kind: input, shape index: {}]   ;;  %s1519_s3 = inlined_call_operand.vmem [shape: f32[64,32], index: 3, kind: input, shape index: {}]   ;;  %s1520_s4 = inlined_call_operand.vmem [shape: f32[64,1], index: 4, kind: input, shape index: {}]   ;;  %s1521_s5 = inlined_call_operand.vmem [shape: f32[32,64], index: 5, kind: input, shape index: {}]   ;;  %s1522_s6 = inlined_call_operand.vmem [shape: f32[32,1], index: 6, kind: input, shape index: {}]   ;;  %s1523_s7 = inlined_call_operand.vmem [shape: f32[32,512], index: 7, kind: output, shape index: {}]  }
   0x1   :  { %s1210_s26 = smov 0  }
   0x2 LB: > { %s1023_s27 = sadd.s32 4294967295, %s1162_s26   ;;  %s1223_s28 = sadd.s32 1, %s1162_s26   ;;  %s1162_s26 = sphi %s1210_s26, %s1527_s26   ;;  %s1158_s25 = sphi %s1208_s25, %s1526_s25   ;;  %s1154_s24 = sphi %s1206_s24, %s1525_s24  }
   0x3   : > { %s21_s29 = ssub.s32 %s1162_s26, %s1223_s28  ;;  %s24_s30 = sadd.s32 1, %s1158_s25 }
   0x4   : > { %p22_p0 = scmp.eq.s32.totalorder %s21_s29, 0  ;;  %p31_p1 = scmp.ne.s32.totalorder %s1158_s25, %s1154_s24 }
   0x5   : > { %p32_p2 = scmp.eq.s32.totalorder %s1162_s26, 0  ;;  %p187_p3 = scmp.eq.s32.totalorder %s1023_s27, 1 }
   0x6   : > { %s1234_s8 = scalar_select %p22_p0, %s1158_s25, %s24_s30  }
   0x7   : > { %p33_p4 = por %p32_p2, %p31_p1  ;;  %p1236_p5 = por %p187_p3, %p31_p1 }
   0x8   : > { %p1026_p6 = scmp.ge.s32.totalorder %s1162_s26, 2 }
   0xa   : > { %227 = sbr.rel (%p1026_p6) target bundleno = 25 (0x19), region = 40 }
  0x11   : > { %230 = sbr.rel (!%p33_p4) target bundleno = 25 (0x19), region = 44  ;;  %s232_s10 = sand.u32 (%p33_p4), 1, %s1158_s25  }
  0x12   : > { %s1050_s11 = sshll.u32 (%p33_p4), %s1162_s26, 4  ;;  %s1027_s12 = sshll.u32 (%p33_p4), %s232_s10, 6 }
  0x13   : > { %s237_s15 = scalar_lea.vmem (%p33_p4), %s1516_s0, %s1050_s11  ;;  %s234_s16 = scalar_lea.vmem (%p33_p4), [#allocation2], %s1027_s12 }
  0x14   : > { %v250_v0 = vld [vmem:[%s237_s15] sm:$0xff] (%p33_p4)  ;;  %v252_v1 = vld [vmem:[%s237_s15 + $0x8] sm:$0xff] (%p33_p4) }
  0x15   : > { %v254_v2 = vld [vmem:[%s237_s15 + $0x20] sm:$0xff] (%p33_p4)  ;;  %251 = vst [vmem:[%s234_s16] sm:$0xff] (%p33_p4), %v250_v0  ;;  %253 = vst [vmem:[%s234_s16 + $0x8] sm:$0xff] (%p33_p4), %v252_v1  ;;  %v256_v3 = vld [vmem:[%s237_s15 + $0x28] sm:$0xff] (%p33_p4) }
  0x16   : > { %255 = vst [vmem:[%s234_s16 + $0x10] sm:$0xff] (%p33_p4), %v254_v2  ;;  %v258_v4 = vld [vmem:[%s237_s15 + $0x40] sm:$0xff] (%p33_p4)  ;;  %v260_v5 = vld [vmem:[%s237_s15 + $0x48] sm:$0xff] (%p33_p4)  ;;  %257 = vst [vmem:[%s234_s16 + $0x18] sm:$0xff] (%p33_p4), %v256_v3 }
  0x17   : > { %259 = vst [vmem:[%s234_s16 + $0x20] sm:$0xff] (%p33_p4), %v258_v4  ;;  %261 = vst [vmem:[%s234_s16 + $0x28] sm:$0xff] (%p33_p4), %v260_v5  ;;  %v262_v6 = vld [vmem:[%s237_s15 + $0x60] sm:$0xff] (%p33_p4)  ;;  %v264_v7 = vld [vmem:[%s237_s15 + $0x68] sm:$0xff] (%p33_p4) }
  0x18   : > { %263 = vst [vmem:[%s234_s16 + $0x30] sm:$0xff] %v262_v6  ;;  %265 = vst [vmem:[%s234_s16 + $0x38] sm:$0xff] %v264_v7 }
  0x19 PF: > { %p1030_p7 = scmp.ge.s32.totalorder %s1162_s26, 1  ;;  %p270_p8 = scmp.lt.s32.totalorder %s1162_s26, 3 }
  0x1b   : > { %p271_p9 = pnand %p1030_p7, %p270_p8 }
  0x1c   : > { %v418_v8 = vld [vmem:[%s1518_s2] sm:$0xff] (!%p271_p9)  ;;  %v1164_v10 = vmov (!%p271_p9), 0   ;;  %v419_v11 = vld [vmem:[%s1518_s2 + $0x8] sm:$0xff] (!%p271_p9)  ;;  %v389_v13 = vld [vmem:[%s1517_s1 + $0x18] sm:$0xff] (!%p271_p9)  ;;  %s277_s17 = sand.u32 (!%p271_p9), 1, %s1154_s24   ;;  %v1165_v23 = vmov (!%p271_p9), 0.0  }
  0x1d   : > { %274 = sbr.rel (%p271_p9) target bundleno = 690 (0x2b2), region = 67  ;;  %v386_v9 = vld [vmem:[%s1517_s1] sm:$0xff] (!%p271_p9)  ;;  %1103 = vset.pattern.permute.xlu1 (!%p271_p9), %v1164_v10  ;;  %1102 = vset.pattern.permute.xlu0 (!%p271_p9), %v1164_v10  ;;  %v387_v12 = vld [vmem:[%s1517_s1 + $0x8] sm:$0xff] (!%p271_p9)  ;;  %v388_v14 = vld [vmem:[%s1517_s1 + $0x10] sm:$0xff] (!%p271_p9)  ;;  %s1273_s18 = sshll.u32 (!%p271_p9), %s277_s17, 6  ;;  %vm506_vm0 = vcmask (!%p271_p9), 261120  }
  0x1e   : > { %424 = vperm.xlu1 (!%p271_p9), %1103, %v418_v8   ;;  %392 = vperm.xlu0 (!%p271_p9), %1102, %v386_v9   ;;  %v421_v15 = vld [vmem:[%s1518_s2 + $0x18] sm:$0xff] (!%p271_p9)  ;;  %v420_v16 = vld [vmem:[%s1518_s2 + $0x10] sm:$0xff] (!%p271_p9)  ;;  %v459_v17 = vld [vmem:[%s1520_s4 + $0x8] sm:$0xff] (!%p271_p9)  ;;  %s279_s10 = scalar_lea.vmem (!%p271_p9), [#allocation2], %s1273_s18  ;;  %vm816_vm1 = vcmask (!%p271_p9), 523264   ;;  %s1481_s20 = scalar_lea.vmem (!%p271_p9), [#allocation3], %s1273_s18 }
  0x1f   : > { %v458_v18 = vld [vmem:[%s1520_s4] sm:$0xff] (!%p271_p9)  ;;  %v461_v19 = vld [vmem:[%s1520_s4 + $0x18] sm:$0xff] (!%p271_p9)  ;;  %v460_v20 = vld [vmem:[%s1520_s4 + $0x10] sm:$0xff] (!%p271_p9)  ;;  %595 = vmatprep.mubr.f32.mxu0 (!%p271_p9), %v1165_v23  ;;  %893 = vmatprep.mubr.f32.mxu1 (!%p271_p9), %v1165_v23 }
  0x20   : > { %v309_v21 = vld [vmem:[%s279_s10] sm:$0xff] (!%p271_p9)  ;;  %v311_v22 = vld [vmem:[%s279_s10 + $0x10] sm:$0xff] (!%p271_p9)  ;;  %v310_v24 = vld [vmem:[%s279_s10 + $0x8] sm:$0xff] (!%p271_p9) }
  0x21   : > { %v312_v25 = vld [vmem:[%s279_s10 + $0x18] sm:$0xff] (!%p271_p9)  ;;  %v463_v26 = vld [vmem:[%s1520_s4 + $0x28] sm:$0xff] (!%p271_p9)  ;;  %v462_v27 = vld [vmem:[%s1520_s4 + $0x20] sm:$0xff] (!%p271_p9)  ;;  %v317_v28 = vadd.f32 (!%p271_p9), %v311_v22, %v309_v21 }
  0x22   : > { %429 = vperm.xlu1 (!%p271_p9), %1103, %v419_v11   ;;  %397 = vperm.xlu0 (!%p271_p9), %1102, %v387_v12   ;;  %v313_v29 = vld [vmem:[%s279_s10 + $0x20] sm:$0xff] (!%p271_p9)  ;;  %v326_v30 = vadd.f32 (!%p271_p9), %v312_v25, %v310_v24  ;;  %v314_v31 = vld [vmem:[%s279_s10 + $0x28] sm:$0xff] (!%p271_p9)  ;;  %v465_v32 = vld [vmem:[%s1520_s4 + $0x38] sm:$0xff] (!%p271_p9) }
  0x23   : > { %v464_v33 = vld [vmem:[%s1520_s4 + $0x30] sm:$0xff] (!%p271_p9)  ;;  %v318_v34 = vadd.f32 (!%p271_p9), %v317_v28, %v313_v29  ;;  %v316_v37 = vld [vmem:[%s279_s10 + $0x38] sm:$0xff] (!%p271_p9)  ;;  %v793_v38 = vld [vmem:[%s1522_s6 + $0x8] sm:$0xff] (!%p271_p9) }
  0x24   : > { %v315_v35 = vld [vmem:[%s279_s10 + $0x30] sm:$0xff]  ;;  %v327_v36 = vadd.f32 %v326_v30, %v314_v31  ;;  %v792_v39 = vld [vmem:[%s1522_s6] sm:$0xff]  ;;  %v795_v42 = vld [vmem:[%s1522_s6 + $0x18] sm:$0xff]  ;;  %s1051_s18 = sshll.u32 (%p1236_p5), %s1023_s27, 4 }
  0x25   : > { %v319_v40 = vadd.f32 %v318_v34, %v315_v35  ;;  %v794_v43 = vld [vmem:[%s1522_s6 + $0x10] sm:$0xff]  ;;  %s935_s23 = scalar_lea.vmem (%p1236_p5), %s1523_s7, %s1051_s18 }
  0x26   : > { %407 = vperm.xlu1 %1103, %v389_v13   ;;  %402 = vperm.xlu0 %1102, %v388_v14   ;;  %v328_v41 = vadd.f32 %v327_v36, %v316_v37 }
  0x27   : > { %v320_v44 = vrot.slane %v319_v40, 4 }
  0x28   : > { %v329_v45 = vrot.slane %v328_v41, 4 }
  0x29   : > { %v321_v46 = vadd.f32 %v320_v44, %v319_v40 }
  0x2a   : > { %439 = vperm.xlu1 %1103, %v421_v15   ;;  %434 = vperm.xlu0 %1102, %v420_v16   ;;  %v330_v47 = vadd.f32 %v329_v45, %v328_v41 }
  0x2b   : > { %v322_v48 = vrot.slane %v321_v46, 2 }
  0x2c   : > { %v331_v49 = vrot.slane %v330_v47, 2 }
  0x2d   : > { %v323_v50 = vadd.f32 %v322_v48, %v321_v46 }
  0x2e   : > { %473 = vperm.xlu1 %1103, %v459_v17   ;;  %468 = vperm.xlu0 %1102, %v458_v18   ;;  %v332_v51 = vadd.f32 %v331_v49, %v330_v47 }
  0x2f   : > { %v324_v52 = vrot.slane %v323_v50, 1 }
  0x30   : > { %v333_v53 = vrot.slane %v332_v51, 1 }
  0x31   : > { %v325_v54 = vadd.f32 %v324_v52, %v323_v50 }
  0x32   : > { %483 = vperm.xlu1 %1103, %v461_v19   ;;  %478 = vperm.xlu0 %1102, %v460_v20   ;;  %v334_v55 = vadd.f32 %v333_v53, %v332_v51 }
  0x33   : > { %v336_v56 = vmul.f32 0.03125, %v325_v54 }
  0x34   : > { %v337_v57 = vmul.f32 0.03125, %v334_v55 }
  0x35   : > { %v338_v58 = vsub.f32 %v309_v21, %v336_v56  ;;  %v340_v59 = vsub.f32 %v311_v22, %v336_v56  ;;  %v342_v62 = vsub.f32 %v313_v29, %v336_v56  ;;  %v344_v4 = vsub.f32 %v315_v35, %v336_v56 }
  0x36   : > { %493 = vperm.xlu1 %1103, %v463_v26   ;;  %488 = vperm.xlu0 %1102, %v462_v27   ;;  %v339_v60 = vsub.f32 %v310_v24, %v337_v57  ;;  %v341_v61 = vsub.f32 %v312_v25, %v337_v57  ;;  %v343_v1 = vsub.f32 %v314_v31, %v337_v57 }
  0x37   : > { %v346_v63 = vmul.f32 %v338_v58, %v338_v58  ;;  %v348_v0 = vmul.f32 %v340_v59, %v340_v59  ;;  %v350_v5 = vmul.f32 %v342_v62, %v342_v62  ;;  %v345_v7 = vsub.f32 %v316_v37, %v337_v57 }
  0x38   : > { %v347_v2 = vmul.f32 %v339_v60, %v339_v60  ;;  %v349_v3 = vmul.f32 %v341_v61, %v341_v61  ;;  %v351_v8 = vmul.f32 %v343_v1, %v343_v1  ;;  %v352_v10 = vmul.f32 %v344_v4, %v344_v4 }
  0x39   : > { %v354_v6 = vadd.f32 %v348_v0, %v346_v63  ;;  %v353_v12 = vmul.f32 %v345_v7, %v345_v7 }
  0x3a   : > { %503 = vperm.xlu1 %1103, %v465_v32   ;;  %498 = vperm.xlu0 %1102, %v464_v33   ;;  %v363_v9 = vadd.f32 %v349_v3, %v347_v2 }
  0x3b   : > { %v355_v11 = vadd.f32 %v354_v6, %v350_v5 }
  0x3c   : > { %v364_v13 = vadd.f32 %v363_v9, %v351_v8  ;;  %v451_v8 = vld [vmem:[%s1519_s3 + $0x8] sm:$0xff]  ;;  %v452_v9 = vld [vmem:[%s1519_s3 + $0x10] sm:$0xff] }
  0x3d   : > { %v356_v14 = vadd.f32 %v355_v11, %v352_v10  ;;  %v453_v10 = vld [vmem:[%s1519_s3 + $0x18] sm:$0xff]  ;;  %v454_v11 = vld [vmem:[%s1519_s3 + $0x20] sm:$0xff] }
  0x3e   : > { %803 = vperm.xlu1 %1103, %v793_v38   ;;  %798 = vperm.xlu0 %1102, %v792_v39   ;;  %v365_v15 = vadd.f32 %v364_v13, %v353_v12  ;;  %v455_v12 = vld [vmem:[%s1519_s3 + $0x28] sm:$0xff]  ;;  %v456_v13 = vld [vmem:[%s1519_s3 + $0x30] sm:$0xff] }
  0x3f   : > { %v357_v16 = vrot.slane %v356_v14, 4 }
  0x40   : > { %v366_v17 = vrot.slane %v365_v15, 4 }
  0x41   : > { %v358_v18 = vadd.f32 %v357_v16, %v356_v14  ;;  %v457_v14 = vld [vmem:[%s1519_s3 + $0x38] sm:$0xff] }
  0x42   : > { %813 = vperm.xlu1 %1103, %v795_v42   ;;  %808 = vperm.xlu0 %1102, %v794_v43   ;;  %v367_v19 = vadd.f32 %v366_v17, %v365_v15 }
  0x43   : > { %v359_v20 = vrot.slane %v358_v18, 2 }
  0x44   : > { %v368_v21 = vrot.slane %v367_v19, 2 }
  0x45   : > { %v360_v22 = vadd.f32 %v359_v20, %v358_v18 }
  0x46   : > { %v369_v24 = vadd.f32 %v368_v21, %v367_v19 }
  0x47   : > { %v361_v25 = vrot.slane %v360_v22, 1 }
  0x48   : > { %v370_v26 = vrot.slane %v369_v24, 1 }
  0x49   : > { %v362_v27 = vadd.f32 %v361_v25, %v360_v22 }
  0x4a   : > { %v371_v28 = vadd.f32 %v370_v26, %v369_v24 }
  0x4b   : > { %v372_v29 = vmul.f32 0.03125, %v362_v27 }
  0x4c   : > { %v373_v30 = vmul.f32 0.03125, %v371_v28 }
  0x4d   : > { %v374_v31 = vadd.f32 1e-05, %v372_v29 }
  0x4e   : > { %v375_v32 = vadd.f32 1e-05, %v373_v30 }
  0x4f   : > { %1104 = vrsqrt.f32 %v374_v31 }
  0x50   : > { %1106 = vrsqrt.f32 %v375_v32 }
  0x59   : > { %v1105_v33 = vpop.eup %1104 }
  0x5a   : > { %v1107_v34 = vpop.eup %1106  ;;  %v378_v37 = vmul.f32 %v1105_v33, %v338_v58  ;;  %v380_v39 = vmul.f32 %v1105_v33, %v340_v59  ;;  %v384_v47 = vmul.f32 %v1105_v33, %v344_v4  ;;  %v382_v48 = vmul.f32 %v1105_v33, %v342_v62 }
  0x5b   : > { %v379_v38 = vmul.f32 %v1107_v34, %v339_v60  ;;  %v381_v40 = vmul.f32 %v1107_v34, %v341_v61  ;;  %v385_v49 = vmul.f32 %v1107_v34, %v345_v7  ;;  %v383_v50 = vmul.f32 %v1107_v34, %v343_v1  ;;  %v450_v7 = vld [vmem:[%s1519_s3] sm:$0xff] }
  0x9d   : > { %v425_v35 = vpop.permute.xlu1 %424  ;;  %v393_v36 = vpop.permute.xlu0 %392 }
  0x9e   : > { %v410_v41 = vmul.f32 %v393_v36, %v378_v37  ;;  %v411_v42 = vmul.f32 %v393_v36, %v379_v38 }
  0xa0   : > { %v443_v55 = vadd.f32 %v425_v35, %v411_v42  ;;  %v442_v56 = vadd.f32 %v425_v35, %v410_v41 }
  0xa1   : > { %v430_v43 = vpop.permute.xlu1 %429  ;;  %v398_v44 = vpop.permute.xlu0 %397 }
  0xa2   : > { %v412_v45 = vmul.f32 %v398_v44, %v380_v39  ;;  %v413_v46 = vmul.f32 %v398_v44, %v381_v40 }
  0xa4   : > { %v445_v51 = vadd.f32 %v430_v43, %v413_v46  ;;  %v444_v52 = vadd.f32 %v430_v43, %v412_v45 }
  0xa5   : > { %v408_v53 = vpop.permute.xlu1 %407  ;;  %v403_v54 = vpop.permute.xlu0 %402 }
  0xa6   : > { %v1052_v57 = vpack.c.bf16 %v445_v51, %v443_v55  ;;  %v1054_v58 = vpack.c.bf16 %v444_v52, %v442_v56  ;;  %v416_v59 = vmul.f32 %v408_v53, %v384_v47  ;;  %v417_v60 = vmul.f32 %v408_v53, %v385_v49 }
  0xa7   : > { %v414_v61 = vmul.f32 %v403_v54, %v382_v48  ;;  %v415_v63 = vmul.f32 %v403_v54, %v383_v50 }
  0xa8   : > { %1053 = vmatprep.subr.bf16.mxu0 %v1052_v57 }
  0xa9   : > { %v440_v0 = vpop.permute.xlu1 %439  ;;  %v435_v2 = vpop.permute.xlu0 %434  ;;  %1055 = vmatpush1.bf16.msra.mxu0 %v1054_v58 }
  0xaa   : > { %v448_v3 = vadd.f32 %v440_v0, %v416_v59  ;;  %v449_v4 = vadd.f32 %v440_v0, %v417_v60  ;;  %v446_v62 = vadd.f32 %v435_v2, %v414_v61  ;;  %v447_v5 = vadd.f32 %v435_v2, %v415_v63 }
  0xac   : > { %v1056_v1 = vpack.c.bf16 %v449_v4, %v447_v5  ;;  %v1058_v6 = vpack.c.bf16 %v448_v3, %v446_v62 }
  0xad   : > { %v469_v15 = vpop.permute.xlu0 %468  ;;  %v474_v21 = vpop.permute.xlu1 %473 }
  0xae   : > { %1057 = vmatprep.subr.bf16.mxu0 %v1056_v1 }
  0xaf   : > { %1059 = vmatpush1.bf16.msra.mxu0 %v1058_v6 }
  0xb1   : > { %v479_v32 = vpop.permute.xlu0 %478  ;;  %v484_v46 = vpop.permute.xlu1 %483 }
  0xb2   : > { %1033 = vmatmul.mubr.msk.f32.vlgmr.msra.gmra.mrb[0].mxu0 %vm506_vm0, %v450_v7 }
  0xb3   : > { %601 = vmatprep.mubr.f32.mxu0 %v1165_v23 }
  0xb5   : > { %v489_v61 = vpop.permute.xlu0 %488 }
  0xb6   : > { %1034 = vmatmul.mubr.msk.f32.gmra.mrb[2].mxu0 %vm506_vm0, %v451_v8 }
  0xb7   : > { %607 = vmatprep.mubr.f32.mxu0 %v1165_v23 }
  0xba   : > { %1035 = vmatmul.mubr.msk.f32.gmra.mrb[4].mxu0 %vm506_vm0, %v452_v9 }
  0xbb   : > { %613 = vmatprep.mubr.f32.mxu0 %v1165_v23 }
  0xbe   : > { %1036 = vmatmul.mubr.msk.f32.gmra.mrb[6].mxu0 %vm506_vm0, %v453_v10 }
  0xbf   : > { %619 = vmatprep.mubr.f32.mxu0 %v1165_v23 }
  0xc2   : > { %1037 = vmatmul.mubr.msk.f32.gmra.mrb[8].mxu0 %vm506_vm0, %v454_v11 }
  0xc3   : > { %625 = vmatprep.mubr.f32.mxu0 %v1165_v23 }
  0xc6   : > { %1038 = vmatmul.mubr.msk.f32.gmra.mrb[10].mxu0 %vm506_vm0, %v455_v12  ;;  %v494_v12 = vpop.permute.xlu1 %493 }
  0xc7   : > { %631 = vmatprep.mubr.f32.mxu0 %v1165_v23 }
  0xca   : > { %1039 = vmatmul.mubr.msk.f32.gmra.mrb[12].mxu0 %vm506_vm0, %v456_v13 }
  0xcb   : > { %637 = vmatprep.mubr.f32.mxu0 %v1165_v23 }
  0xce   : > { %1040 = vmatmul.mubr.msk.f32.gmra.mrb[14].mxu0 %vm506_vm0, %v457_v14 }
 0x185   : > { %v597_v16 = vpop.f32.mrb[0].mxu0 }
 0x186   : > { %v1353_v17 = vadd.f32 %v597_v16, %v469_v15  ;;  %v599_v18 = vpop.f32.mrb[1].mxu0 }
 0x187   : > { %v1355_v19 = vadd.f32 %v599_v18, %v469_v15 }
 0x188   : > { %v644_v20 = vmul.f32 %v1353_v17, %v1353_v17 }
 0x189   : > { %v645_v22 = vmul.f32 %v1355_v19, %v1355_v19  ;;  %v603_v24 = vpop.f32.mrb[2].mxu0 }
 0x18a   : > { %v660_v25 = vmul.f32 %v644_v20, %v1353_v17  ;;  %v1362_v26 = vadd.f32 %v603_v24, %v474_v21  ;;  %v605_v27 = vpop.f32.mrb[3].mxu0 }
 0x18b   : > { %v661_v28 = vmul.f32 %v645_v22, %v1355_v19  ;;  %v1365_v29 = vadd.f32 %v605_v27, %v474_v21 }
 0x18c   : > { %v676_v30 = vmul.f32 0.044715, %v660_v25  ;;  %v646_v31 = vmul.f32 %v1362_v26, %v1362_v26 }
 0x18d   : > { %v677_v33 = vmul.f32 0.044715, %v661_v28  ;;  %v647_v34 = vmul.f32 %v1365_v29, %v1365_v29  ;;  %v609_v35 = vpop.f32.mrb[4].mxu0 }
 0x18e   : > { %v692_v36 = vadd.f32 %v676_v30, %v1353_v17  ;;  %v662_v37 = vmul.f32 %v646_v31, %v1362_v26  ;;  %v1373_v38 = vadd.f32 %v609_v35, %v479_v32  ;;  %v611_v39 = vpop.f32.mrb[5].mxu0 }
 0x18f   : > { %v663_v40 = vmul.f32 %v647_v34, %v1365_v29  ;;  %v1376_v41 = vadd.f32 %v611_v39, %v479_v32  ;;  %v693_v42 = vadd.f32 %v677_v33, %v1355_v19  ;;  %v499_v34 = vpop.permute.xlu0 %498 }
 0x190   : > { %v708_v43 = vmul.f32 0.7978846, %v692_v36  ;;  %v678_v44 = vmul.f32 0.044715, %v662_v37  ;;  %v648_v45 = vmul.f32 %v1373_v38, %v1373_v38 }
 0x191   : > { %v679_v47 = vmul.f32 0.044715, %v663_v40  ;;  %v649_v48 = vmul.f32 %v1376_v41, %v1376_v41  ;;  %v615_v49 = vpop.f32.mrb[6].mxu0  ;;  %v709_v50 = vmul.f32 0.7978846, %v693_v42 }
 0x192   : > { %v694_v51 = vadd.f32 %v678_v44, %v1362_v26  ;;  %v664_v52 = vmul.f32 %v648_v45, %v1373_v38  ;;  %v1385_v53 = vadd.f32 %v615_v49, %v484_v46  ;;  %v617_v54 = vpop.f32.mrb[7].mxu0  ;;  %1108 = vtanh.f32 %v708_v43 }
 0x193   : > { %v665_v55 = vmul.f32 %v649_v48, %v1376_v41  ;;  %v1388_v56 = vadd.f32 %v617_v54, %v484_v46  ;;  %v695_v57 = vadd.f32 %v679_v47, %v1365_v29  ;;  %1110 = vtanh.f32 %v709_v50 }
 0x194   : > { %v710_v58 = vmul.f32 0.7978846, %v694_v51  ;;  %v680_v59 = vmul.f32 0.044715, %v664_v52  ;;  %v650_v60 = vmul.f32 %v1385_v53, %v1385_v53 }
 0x195   : > { %v681_v63 = vmul.f32 0.044715, %v665_v55  ;;  %v651_v0 = vmul.f32 %v1388_v56, %v1388_v56  ;;  %v621_v2 = vpop.f32.mrb[8].mxu0  ;;  %v711_v3 = vmul.f32 0.7978846, %v695_v57  ;;  %v504_v57 = vpop.permute.xlu1 %503 }
 0x196   : > { %v696_v4 = vadd.f32 %v680_v59, %v1373_v38  ;;  %v666_v62 = vmul.f32 %v650_v60, %v1385_v53  ;;  %v1397_v5 = vadd.f32 %v621_v2, %v489_v61  ;;  %v623_v1 = vpop.f32.mrb[9].mxu0  ;;  %1112 = vtanh.f32 %v710_v58 }
 0x197   : > { %v697_v6 = vadd.f32 %v681_v63, %v1376_v41  ;;  %v667_v7 = vmul.f32 %v651_v0, %v1388_v56  ;;  %v1401_v8 = vadd.f32 %v623_v1, %v489_v61  ;;  %1114 = vtanh.f32 %v711_v3 }
 0x198   : > { %v712_v9 = vmul.f32 0.7978846, %v696_v4  ;;  %v682_v10 = vmul.f32 0.044715, %v666_v62  ;;  %v652_v11 = vmul.f32 %v1397_v5, %v1397_v5 }
 0x199   : > { %v713_v13 = vmul.f32 0.7978846, %v697_v6  ;;  %v683_v14 = vmul.f32 0.044715, %v667_v7  ;;  %v653_v15 = vmul.f32 %v1401_v8, %v1401_v8  ;;  %v627_v16 = vpop.f32.mrb[10].mxu0 }
 0x19a   : > { %v698_v18 = vadd.f32 %v682_v10, %v1385_v53  ;;  %v668_v20 = vmul.f32 %v652_v11, %v1397_v5  ;;  %v1409_v21 = vadd.f32 %v627_v16, %v494_v12  ;;  %v629_v22 = vpop.f32.mrb[11].mxu0  ;;  %1116 = vtanh.f32 %v712_v9 }
 0x19b   : > { %v699_v24 = vadd.f32 %v683_v14, %v1388_v56  ;;  %v669_v25 = vmul.f32 %v653_v15, %v1401_v8  ;;  %v1413_v27 = vadd.f32 %v629_v22, %v494_v12  ;;  %1118 = vtanh.f32 %v713_v13 }
 0x19c   : > { %v1109_v28 = vpop.eup %1108  ;;  %v714_v30 = vmul.f32 0.7978846, %v698_v18  ;;  %v684_v31 = vmul.f32 0.044715, %v668_v20  ;;  %v654_v32 = vmul.f32 %v1409_v21, %v1409_v21 }
 0x19d   : > { %v1111_v33 = vpop.eup %1110  ;;  %v715_v35 = vmul.f32 0.7978846, %v699_v24  ;;  %v685_v36 = vmul.f32 0.044715, %v669_v25  ;;  %v655_v37 = vmul.f32 %v1413_v27, %v1413_v27  ;;  %v633_v39 = vpop.f32.mrb[12].mxu0  ;;  %v740_v40 = vadd.f32 1.0, %v1109_v28 }
 0x19e   : > { %1120 = vtanh.f32 %v714_v30  ;;  %v700_v42 = vadd.f32 %v684_v31, %v1397_v5  ;;  %v670_v43 = vmul.f32 %v654_v32, %v1409_v21  ;;  %v1421_v44 = vadd.f32 %v633_v39, %v499_v34  ;;  %v635_v45 = vpop.f32.mrb[13].mxu0 }
 0x19f   : > { %1122 = vtanh.f32 %v715_v35  ;;  %v701_v46 = vadd.f32 %v685_v36, %v1401_v8  ;;  %v671_v47 = vmul.f32 %v655_v37, %v1413_v27  ;;  %v1425_v48 = vadd.f32 %v635_v45, %v499_v34 }
 0x1a0   : > { %v1113_v49 = vpop.eup %1112  ;;  %v716_v50 = vmul.f32 0.7978846, %v700_v42  ;;  %v686_v51 = vmul.f32 0.044715, %v670_v43  ;;  %v656_v52 = vmul.f32 %v1421_v44, %v1421_v44  ;;  %v741_v54 = vadd.f32 1.0, %v1111_v33 }
 0x1a1   : > { %v1115_v55 = vpop.eup %1114  ;;  %v717_v58 = vmul.f32 0.7978846, %v701_v46  ;;  %v687_v59 = vmul.f32 0.044715, %v671_v47  ;;  %v657_v60 = vmul.f32 %v1425_v48, %v1425_v48  ;;  %v639_v61 = vpop.f32.mrb[14].mxu0  ;;  %v742_v63 = vadd.f32 1.0, %v1113_v49 }
 0x1a2   : > { %1124 = vtanh.f32 %v716_v50  ;;  %v702_v0 = vadd.f32 %v686_v51, %v1409_v21  ;;  %v672_v2 = vmul.f32 %v656_v52, %v1421_v44  ;;  %v1433_v3 = vadd.f32 %v639_v61, %v504_v57  ;;  %v641_v4 = vpop.f32.mrb[15].mxu0 }
 0x1a3   : > { %1126 = vtanh.f32 %v717_v58  ;;  %v703_v62 = vadd.f32 %v687_v59, %v1413_v27  ;;  %v673_v1 = vmul.f32 %v657_v60, %v1425_v48  ;;  %v1437_v6 = vadd.f32 %v641_v4, %v504_v57 }
 0x1a4   : > { %v718_v7 = vmul.f32 0.7978846, %v702_v0  ;;  %v688_v9 = vmul.f32 0.044715, %v672_v2  ;;  %v658_v10 = vmul.f32 %v1433_v3, %v1433_v3  ;;  %v743_v11 = vadd.f32 1.0, %v1115_v55  ;;  %v1117_v12 = vpop.eup %1116 }
 0x1a5   : > { %v719_v13 = vmul.f32 0.7978846, %v703_v62  ;;  %v689_v14 = vmul.f32 0.044715, %v673_v1  ;;  %v659_v15 = vmul.f32 %v1437_v6, %v1437_v6  ;;  %v757_v16 = vmul.f32 0.5, %v741_v54  ;;  %v1119_v18 = vpop.eup %1118 }
 0x1a6   : > { %1128 = vtanh.f32 %v718_v7  ;;  %v704_v20 = vadd.f32 %v688_v9, %v1421_v44  ;;  %v674_v22 = vmul.f32 %v658_v10, %v1433_v3  ;;  %v759_v24 = vmul.f32 0.5, %v743_v11 }
 0x1a7   : > { %1130 = vtanh.f32 %v719_v13  ;;  %v705_v25 = vadd.f32 %v689_v14, %v1425_v48  ;;  %v675_v28 = vmul.f32 %v659_v15, %v1437_v6  ;;  %v773_v30 = vmul.f32 %v757_v16, %v1355_v19 }
 0x1a8   : > { %v1121_v31 = vpop.eup %1120  ;;  %v720_v32 = vmul.f32 0.7978846, %v704_v20  ;;  %v690_v33 = vmul.f32 0.044715, %v674_v22  ;;  %v775_v34 = vmul.f32 %v759_v24, %v1365_v29  ;;  %v756_v35 = vmul.f32 0.5, %v740_v40 }
 0x1a9   : > { %v1123_v36 = vpop.eup %1122  ;;  %v721_v37 = vmul.f32 0.7978846, %v705_v25  ;;  %v691_v39 = vmul.f32 0.044715, %v675_v28  ;;  %v758_v42 = vmul.f32 0.5, %v742_v63  ;;  %v745_v43 = vadd.f32 1.0, %v1119_v18 }
 0x1aa   : > { %1132 = vtanh.f32 %v720_v32  ;;  %v706_v45 = vadd.f32 %v690_v33, %v1433_v3  ;;  %v1060_v46 = vpack.c.bf16 %v775_v34, %v773_v30  ;;  %v772_v47 = vmul.f32 %v756_v35, %v1353_v17 }
 0x1ab   : > { %1134 = vtanh.f32 %v721_v37  ;;  %v707_v19 = vadd.f32 %v691_v39, %v1437_v6  ;;  %v774_v49 = vmul.f32 %v758_v42, %v1362_v26  ;;  %v747_v50 = vadd.f32 1.0, %v1123_v36  ;;  %v788_v42 = vld [vmem:[%s1521_s5] sm:$0xff] }
 0x1ac   : > { %v1125_v51 = vpop.eup %1124  ;;  %v722_v29 = vmul.f32 0.7978846, %v706_v45  ;;  %1061 = vmatprep.subr.bf16.mxu1 %v1060_v46  ;;  %v761_v40 = vmul.f32 0.5, %v745_v43  ;;  %v744_v52 = vadd.f32 1.0, %v1117_v12  ;;  %v746_v54 = vadd.f32 1.0, %v1121_v31 }
 0x1ad   : > { %v1127_v55 = vpop.eup %1126  ;;  %v723_v57 = vmul.f32 0.7978846, %v707_v19  ;;  %v1062_v58 = vpack.c.bf16 %v774_v49, %v772_v47  ;;  %v763_v59 = vmul.f32 0.5, %v747_v50  ;;  %v748_v60 = vadd.f32 1.0, %v1125_v51 }
 0x1ae   : > { %1136 = vtanh.f32 %v722_v29  ;;  %v760_v61 = vmul.f32 0.5, %v744_v52  ;;  %v762_v17 = vmul.f32 0.5, %v746_v54  ;;  %v777_v63 = vmul.f32 %v761_v40, %v1376_v41 }
 0x1af   : > { %1138 = vtanh.f32 %v723_v57  ;;  %1063 = vmatpush1.bf16.msra.mxu1 %v1062_v58  ;;  %v779_v26 = vmul.f32 %v763_v59, %v1388_v56  ;;  %v749_v0 = vadd.f32 1.0, %v1127_v55  ;;  %v764_v10 = vmul.f32 0.5, %v748_v60 }
 0x1b0   : > { %v1129_v2 = vpop.eup %1128  ;;  %v776_v4 = vmul.f32 %v760_v61, %v1373_v38  ;;  %v778_v62 = vmul.f32 %v762_v17, %v1385_v53 }
 0x1b1   : > { %v1131_v1 = vpop.eup %1130  ;;  %v1064_v7 = vpack.c.bf16 %v779_v26, %v777_v63  ;;  %v750_v9 = vadd.f32 1.0, %v1129_v2  ;;  %v765_v13 = vmul.f32 0.5, %v749_v0  ;;  %v780_v56 = vmul.f32 %v764_v10, %v1397_v5 }
 0x1b2   : > { %v1066_v11 = vpack.c.bf16 %v778_v62, %v776_v4  ;;  %v751_v12 = vadd.f32 1.0, %v1131_v1 }
 0x1b3   : > { %1065 = vmatprep.subr.bf16.mxu1 %v1064_v7  ;;  %v766_v14 = vmul.f32 0.5, %v750_v9  ;;  %v781_v53 = vmul.f32 %v765_v13, %v1401_v8 }
 0x1b4   : > { %v1133_v15 = vpop.eup %1132  ;;  %1067 = vmatpush1.bf16.msra.mxu1 %v1066_v11  ;;  %v767_v41 = vmul.f32 0.5, %v751_v12 }
 0x1b5   : > { %v1135_v16 = vpop.eup %1134  ;;  %v782_v18 = vmul.f32 %v766_v14, %v1409_v21  ;;  %v752_v38 = vadd.f32 1.0, %v1133_v15 }
 0x1b6   : > { %v783_v20 = vmul.f32 %v767_v41, %v1413_v27  ;;  %v753_v22 = vadd.f32 1.0, %v1135_v16 }
 0x1b7   : > { %v1070_v24 = vpack.c.bf16 %v782_v18, %v780_v56  ;;  %v768_v32 = vmul.f32 0.5, %v752_v38 }
 0x1b8   : > { %v1137_v25 = vpop.eup %1136  ;;  %v1068_v28 = vpack.c.bf16 %v783_v20, %v781_v53  ;;  %v769_v34 = vmul.f32 0.5, %v753_v22 }
 0x1b9   : > { %v1139_v30 = vpop.eup %1138  ;;  %v754_v31 = vadd.f32 1.0, %v1137_v25  ;;  %v784_v21 = vmul.f32 %v768_v32, %v1421_v44  ;;  %v789_v44 = vld [vmem:[%s1521_s5 + $0x8] sm:$0xff] }
 0x1ba   : > { %1069 = vmatprep.subr.bf16.mxu1 %v1068_v28  ;;  %v755_v33 = vadd.f32 1.0, %v1139_v30  ;;  %v785_v8 = vmul.f32 %v769_v34, %v1425_v48  ;;  %v790_v48 = vld [vmem:[%s1521_s5 + $0x10] sm:$0xff] }
 0x1bb   : > { %1071 = vmatpush1.bf16.msra.mxu1 %v1070_v24  ;;  %v770_v35 = vmul.f32 0.5, %v754_v31 }
 0x1bc   : > { %v771_v5 = vmul.f32 0.5, %v755_v33 }
 0x1bd   : > { %v786_v36 = vmul.f32 %v770_v35, %v1433_v3  ;;  %v791_v3 = vld [vmem:[%s1521_s5 + $0x18] sm:$0xff] }
 0x1be   : > { %v787_v27 = vmul.f32 %v771_v5, %v1437_v6  ;;  %v799_v6 = vpop.permute.xlu0 %798 }
 0x1bf   : > { %v1074_v37 = vpack.c.bf16 %v786_v36, %v784_v21 }
 0x1c0   : > { %v1072_v39 = vpack.c.bf16 %v787_v27, %v785_v8 }
 0x1c2   : > { %1073 = vmatprep.subr.bf16.mxu1 %v1072_v39  ;;  %v809_v29 = vpop.permute.xlu0 %808 }
 0x1c3   : > { %1075 = vmatpush1.bf16.msra.mxu1 %v1074_v37 }
 0x1c6   : > { %1041 = vmatmul.mubr.msk.f32.vlgmr.msra.gmra.mrb[0].mxu1 %vm816_vm1, %v788_v42 }
 0x1c7   : > { %899 = vmatprep.mubr.f32.mxu1 %v1165_v23 }
 0x1ca   : > { %1042 = vmatmul.mubr.msk.f32.gmra.mrb[2].mxu1 %vm816_vm1, %v789_v44 }
 0x1cb   : > { %905 = vmatprep.mubr.f32.mxu1 %v1165_v23 }
 0x1ce   : > { %1043 = vmatmul.mubr.msk.f32.gmra.mrb[4].mxu1 %vm816_vm1, %v790_v48 }
 0x1cf   : > { %911 = vmatprep.mubr.f32.mxu1 %v1165_v23  ;;  %v804_v23 = vpop.permute.xlu1 %803 }
 0x1d2   : > { %1044 = vmatmul.mubr.msk.f32.gmra.mrb[6].mxu1 %vm816_vm1, %v791_v3 }
 0x1d3   : > { %v814_v57 = vpop.permute.xlu1 %813 }
 0x299   : > { %v895_v43 = vpop.f32.mrb[0].mxu1 }
 0x29a   : > { %v896_v45 = vadd.f32 %v895_v43, %v799_v6  ;;  %v897_v46 = vpop.f32.mrb[1].mxu1 }
 0x29b   : > { %v898_v47 = vadd.f32 %v897_v46, %v799_v6 }
 0x29c   : > { %918 = vst [vmem:[%s1481_s20] sm:$0xff] %v896_v45 }
 0x29d   : > { %919 = vst [vmem:[%s1481_s20 + $0x8] sm:$0xff] %v898_v47  ;;  %v901_v19 = vpop.f32.mrb[2].mxu1 }
 0x29e   : > { %v902_v49 = vadd.f32 %v901_v19, %v804_v23  ;;  %v903_v50 = vpop.f32.mrb[3].mxu1 }
 0x29f   : > { %v904_v51 = vadd.f32 %v903_v50, %v804_v23 }
 0x2a0   : > { %920 = vst [vmem:[%s1481_s20 + $0x10] sm:$0xff] %v902_v49 }
 0x2a1   : > { %921 = vst [vmem:[%s1481_s20 + $0x18] sm:$0xff] %v904_v51  ;;  %v907_v40 = vpop.f32.mrb[4].mxu1 }
 0x2a2   : > { %v908_v52 = vadd.f32 %v907_v40, %v809_v29  ;;  %v909_v54 = vpop.f32.mrb[5].mxu1 }
 0x2a3   : > { %v910_v55 = vadd.f32 %v909_v54, %v809_v29  ;;  %932 = sbr.rel (!%p1236_p5) target bundleno = 690 (0x2b2), region = 75  ;;  %v948_v17 = vld [vmem:[%s1481_s20] sm:$0xff] (%p1236_p5) }
 0x2a4   : > { %922 = vst [vmem:[%s1481_s20 + $0x20] sm:$0xff] %v908_v52  ;;  %v950_v63 = vld [vmem:[%s1481_s20 + $0x8] sm:$0xff] (%p1236_p5)  ;;  %949 = vst [vmem:[%s935_s23] sm:$0xff] (%p1236_p5), %v948_v17 }
 0x2a5   : > { %923 = vst [vmem:[%s1481_s20 + $0x28] sm:$0xff] %v910_v55  ;;  %v913_v58 = vpop.f32.mrb[6].mxu1  ;;  %951 = vst [vmem:[%s935_s23 + $0x8] sm:$0xff] (%p1236_p5), %v950_v63 }
 0x2a6   : > { %v914_v59 = vadd.f32 %v913_v58, %v814_v57  ;;  %v915_v60 = vpop.f32.mrb[7].mxu1 }
 0x2a7   : > { %v916_v61 = vadd.f32 %v915_v60, %v814_v57  ;;  %v952_v26 = vld [vmem:[%s1481_s20 + $0x10] sm:$0xff] (%p1236_p5) }
 0x2a8   : > { %924 = vst [vmem:[%s1481_s20 + $0x30] sm:$0xff] %v914_v59  ;;  %v954_v0 = vld [vmem:[%s1481_s20 + $0x18] sm:$0xff] (%p1236_p5)  ;;  %953 = vst [vmem:[%s935_s23 + $0x20] sm:$0xff] (%p1236_p5), %v952_v26 }
 0x2a9   : > { %925 = vst [vmem:[%s1481_s20 + $0x38] sm:$0xff] %v916_v61  ;;  %955 = vst [vmem:[%s935_s23 + $0x28] sm:$0xff] (%p1236_p5), %v954_v0 }
 0x2ab   : > { %v956_v2 = vld [vmem:[%s1481_s20 + $0x20] sm:$0xff] }
 0x2ac   : > { %v958_v4 = vld [vmem:[%s1481_s20 + $0x28] sm:$0xff]  ;;  %957 = vst [vmem:[%s935_s23 + $0x40] sm:$0xff] %v956_v2 }
 0x2ad   : > { %959 = vst [vmem:[%s935_s23 + $0x48] sm:$0xff] %v958_v4 }
 0x2af   : > { %v960_v62 = vld [vmem:[%s1481_s20 + $0x30] sm:$0xff] }
 0x2b0   : > { %v962_v1 = vld [vmem:[%s1481_s20 + $0x38] sm:$0xff]  ;;  %961 = vst [vmem:[%s935_s23 + $0x60] sm:$0xff] %v960_v62 }
 0x2b1   : > { %963 = vst [vmem:[%s935_s23 + $0x68] sm:$0xff] %v962_v1 }
 0x2b2 PF: > { %p14_p10 = scmp.ge.s32.totalorder %s1223_s28, 4   ;;  %s1525_s24 = smov %s1158_s25 }
 0x2b3   : > { %s1526_s25 = smov %s1234_s8  ;;  %s1527_s26 = smov %s1223_s28 }
 0x2b4   :  { %16 = sbr.rel (!%p14_p10) target bundleno = 2 (0x2), region = 129 }

</bundles_post_ra>
